<compile_context>
chip_gen: v7x
topology: tpu7x:2x2x1
jax: 0.10.0
libtpu: 0.0.40
codegen_flags: <defaults>
</compile_context>

<pallas_src>
import jax
import jax.numpy as jnp
from jax.experimental import pallas as pl
from jax.experimental.pallas import tpu as pltpu

_LANE = 128  # TPU lane width (last-dim alignment)


def _round_up(n, m):
    return (n + m - 1) // m * m


def _block_diag(w, reps):
    """(a, b) -> (reps*a, reps*b) block-diagonal with `reps` copies of w."""
    if reps == 1:
        return w
    a, b = w.shape
    eye = jnp.eye(reps, dtype=w.dtype)
    return (eye[:, None, :, None] * w[None, :, None, :]).reshape(reps * a, reps * b)


def _mlp_kernel(x_ref, w1_ref, b1_ref, w2_ref, b2_ref, o_ref):
    # Cast f32 -> bf16 inside the kernel (VPU), keep f32 accumulation on MXU.
    x = x_ref[...].astype(w1_ref.dtype)
    h = jnp.dot(x, w1_ref[...], preferred_element_type=jnp.float32)
    h = jnp.maximum(h + b1_ref[...], 0.0)            # (TB, P*H) + (1, P*H)
    y = jnp.dot(h.astype(w2_ref.dtype), w2_ref[...],
                preferred_element_type=jnp.float32)
    o_ref[...] = (y + b2_ref[...]).astype(o_ref.dtype)


def occupancy_encoder_forward(x, w1, b1, w2, b2, *,
                              block_rows=4096,
                              compute_dtype=jnp.bfloat16):
    """Forward pass of OccupancyEncoder.

    x:  (B, input_size)
    w1: (input_size, hidden)  (pre-transposed vs. torch nn.Linear.weight)
    b1: (hidden,)
    w2: (hidden, output)
    b2: (output,)
    Returns (B, output) in x.dtype.
    """
    B, in_size = x.shape
    hid = w1.shape[1]
    out_size = w2.shape[1]
    out_dtype = x.dtype

    # Batch-pack factor: fold `pack` consecutive batch rows into the 128-lane
    # dimension when the input width divides the lane width; else pack = 1
    # (which degenerates to plain unpadded blocks — still lane-exact).
    pack = _LANE // in_size if (_LANE % in_size == 0 and in_size < _LANE) else 1

    Bp = _round_up(B, pack)
    if Bp != B:  # at most pack-1 extra zero rows; not hit when B % pack == 0
        x = jnp.pad(x, ((0, Bp - B), (0, 0)))
    rows = Bp // pack

    in_p, hid_p, out_p = pack * in_size, pack * hid, pack * out_size

    xp = x.reshape(rows, in_p)                       # zero-copy row-major reshape
    w1p = _block_diag(w1, pack).astype(compute_dtype)        # (in_p, hid_p)
    w2p = _block_diag(w2, pack).astype(compute_dtype)        # (hid_p, out_p)
    b1p = jnp.tile(b1.astype(jnp.float32), pack).reshape(1, hid_p)
    b2p = jnp.tile(b2.astype(jnp.float32), pack).reshape(1, out_p)

    # Batch tile (in packed rows): multiple of 8 sublanes, capped to the data.
    tb = _round_up(min(block_rows, _round_up(rows, 8)), 8)
    grid = (pl.cdiv(rows, tb),)

    # True (unpadded) flops / bytes.
    x_item = jnp.dtype(x.dtype).itemsize
    w_item = jnp.dtype(compute_dtype).itemsize
    cost = pl.CostEstimate(
        flops=2 * B * (in_size * hid + hid * out_size),
        transcendentals=0,
        bytes_accessed=(B * in_size * x_item
                        + B * out_size * jnp.dtype(out_dtype).itemsize
                        + (w1p.size + w2p.size) * w_item
                        + (b1p.size + b2p.size) * 4),
    )

    out_packed = pl.pallas_call(
        _mlp_kernel,
        out_shape=jax.ShapeDtypeStruct((rows, out_p), out_dtype),
        grid=grid,
        in_specs=[
            pl.BlockSpec((tb, in_p), lambda i: (i, 0)),     # x: pipelined per tile
            pl.BlockSpec((in_p, hid_p), lambda i: (0, 0)),  # w1: resident in VMEM
            pl.BlockSpec((1, hid_p), lambda i: (0, 0)),     # b1: resident
            pl.BlockSpec((hid_p, out_p), lambda i: (0, 0)), # w2: resident
            pl.BlockSpec((1, out_p), lambda i: (0, 0)),     # b2: resident
        ],
        out_specs=pl.BlockSpec((tb, out_p), lambda i: (i, 0)),
        compiler_params=pltpu.CompilerParams(
            dimension_semantics=("parallel",),              # megacore on v7x
            vmem_limit_bytes=40 * 1024 * 1024),
        cost_estimate=cost,
    )(xp, w1p, b1p, w2p, b2p)

    # Zero-copy unpack back to (Bp, out_size); drop pad rows only if added.
    out = out_packed.reshape(Bp, out_size)
    return out[:B] if Bp != B else out


def init_params(key, input_size, hidden_size, output_size, dtype=jnp.float32):
    """Deterministic init matching nn.Linear's default U(-1/sqrt(fan_in), +...)."""
    k1, k2, k3, k4 = jax.random.split(key, 4)
    bound1 = 1.0 / jnp.sqrt(input_size)
    bound2 = 1.0 / jnp.sqrt(hidden_size)
    # Stored pre-transposed: (in_features, out_features)
    w1 = jax.random.uniform(k1, (input_size, hidden_size), dtype,
                            minval=-bound1, maxval=bound1)
    b1 = jax.random.uniform(k2, (hidden_size,), dtype,
                            minval=-bound1, maxval=bound1)
    w2 = jax.random.uniform(k3, (hidden_size, output_size), dtype,
                            minval=-bound2, maxval=bound2)
    b2 = jax.random.uniform(k4, (output_size,), dtype,
                            minval=-bound2, maxval=bound2)
    return w1, b1, w2, b2


if __name__ == "__main__":
    batch = 8
    input_size = 16
    hidden_size = 32
    output_size = 8

    key = jax.random.PRNGKey(0)
    kx, kp = jax.random.split(key)
    x = jax.random.normal(kx, (batch, input_size), jnp.float32)
    w1, b1, w2, b2 = init_params(kp, input_size, hidden_size, output_size)

    out = occupancy_encoder_forward(x, w1, b1, w2, b2)
    out = jax.block_until_ready(out)
    assert out.shape == (batch, output_size)

    # Tight check against the same bf16-input / f32-accumulate math as the
    # kernel (block-diagonal packing is exact, so this should match closely).
    xb, w1b, w2b = (a.astype(jnp.bfloat16) for a in (x, w1, w2))
    h_ref = jnp.maximum(
        jnp.dot(xb, w1b, preferred_element_type=jnp.float32) + b1, 0.0)
    ref_bf16 = jnp.dot(h_ref.astype(jnp.bfloat16), w2b,
                       preferred_element_type=jnp.float32) + b2
    assert jnp.allclose(out, ref_bf16, atol=2e-3, rtol=2e-3)

    # Loose check against the pure-f32 module semantics (bf16 MXU inputs give
    # sub-percent relative error, acceptable for this ReLU-MLP encoder).
    ref_f32 = jnp.maximum(x @ w1 + b1, 0.0) @ w2 + b2
    assert jnp.allclose(out, ref_f32, atol=1e-1, rtol=1e-1)

    print("KERNEL_OK")
</pallas_src>

<mosaic_0001>
module attributes {stable_mosaic.version = 11 : i64} {
  func.func @_mlp_kernel(%arg0: i32, %arg1: memref<8x128xf32, #tpu.memory_space<vmem>>, %arg2: memref<128x256xbf16, #tpu.memory_space<vmem>>, %arg3: memref<1x256xf32, #tpu.memory_space<vmem>>, %arg4: memref<256x64xbf16, #tpu.memory_space<vmem>>, %arg5: memref<1x64xf32, #tpu.memory_space<vmem>>, %arg6: memref<8x64xf32, #tpu.memory_space<vmem>>) attributes {dimension_semantics = [#tpu.dimension_semantics<parallel>], iteration_bounds = array<i64: 1>, scalar_prefetch = 0 : i64, scratch_operands = 0 : i64, tpu.core_type = #tpu.core_type<tc>, window_params = [{transform_indices = @transform_0, window_bounds = array<i64: 8, 128>}, {pipeline_mode = #tpu.pipeline_mode<synchronous>, transform_indices = @transform_1, window_bounds = array<i64: 128, 256>}, {pipeline_mode = #tpu.pipeline_mode<synchronous>, transform_indices = @transform_2, window_bounds = array<i64: 1, 256>}, {pipeline_mode = #tpu.pipeline_mode<synchronous>, transform_indices = @transform_3, window_bounds = array<i64: 256, 64>}, {pipeline_mode = #tpu.pipeline_mode<synchronous>, transform_indices = @transform_4, window_bounds = array<i64: 1, 64>}, {transform_indices = @transform_5, window_bounds = array<i64: 8, 64>}]} {
    %c0 = arith.constant 0 : index
    %c0_0 = arith.constant 0 : index
    %0 = vector.load %arg1[%c0, %c0_0] : memref<8x128xf32, #tpu.memory_space<vmem>>, vector<8x128xf32>
    %1 = arith.truncf %0 : vector<8x128xf32> to vector<8x128xbf16>
    %c0_1 = arith.constant 0 : index
    %c0_2 = arith.constant 0 : index
    %2 = vector.load %arg2[%c0_1, %c0_2] : memref<128x256xbf16, #tpu.memory_space<vmem>>, vector<128x256xbf16>
    %cst = arith.constant dense<0.000000e+00> : vector<8x256xf32>
    %3 = tpu.matmul %1, %2, %cst {dimension_numbers = #tpu.dot_dimension_numbers<[1], [0], [0], [1], [0, 0, 1, 1], [], []>} : vector<8x128xbf16>, vector<128x256xbf16>, vector<8x256xf32> -> vector<8x256xf32>
    %c0_3 = arith.constant 0 : index
    %c0_4 = arith.constant 0 : index
    %4 = vector.load %arg3[%c0_3, %c0_4] : memref<1x256xf32, #tpu.memory_space<vmem>>, vector<1x256xf32>
    %5 = vector.broadcast %4 : vector<1x256xf32> to vector<8x256xf32>
    %6 = arith.addf %3, %5 : vector<8x256xf32>
    %cst_5 = arith.constant 0.000000e+00 : f32
    %7 = vector.broadcast %cst_5 : f32 to vector<8x256xf32>
    %8 = arith.maximumf %6, %7 : vector<8x256xf32>
    %9 = arith.truncf %8 : vector<8x256xf32> to vector<8x256xbf16>
    %c0_6 = arith.constant 0 : index
    %c0_7 = arith.constant 0 : index
    %10 = vector.load %arg4[%c0_6, %c0_7] : memref<256x64xbf16, #tpu.memory_space<vmem>>, vector<256x64xbf16>
    %cst_8 = arith.constant dense<0.000000e+00> : vector<8x64xf32>
    %11 = tpu.matmul %9, %10, %cst_8 {dimension_numbers = #tpu.dot_dimension_numbers<[1], [0], [0], [1], [0, 0, 1, 1], [], []>} : vector<8x256xbf16>, vector<256x64xbf16>, vector<8x64xf32> -> vector<8x64xf32>
    %c0_9 = arith.constant 0 : index
    %c0_10 = arith.constant 0 : index
    %12 = vector.load %arg5[%c0_9, %c0_10] : memref<1x64xf32, #tpu.memory_space<vmem>>, vector<1x64xf32>
    %13 = vector.broadcast %12 : vector<1x64xf32> to vector<8x64xf32>
    %14 = arith.addf %11, %13 : vector<8x64xf32>
    %c0_11 = arith.constant 0 : index
    %c0_12 = arith.constant 0 : index
    %15 = vector.load %arg6[%c0_11, %c0_12] : memref<8x64xf32, #tpu.memory_space<vmem>>, vector<8x64xf32>
    tpu.vector_store %arg6[%c0_11, %c0_12], %14 {strides = array<i32>} : memref<8x64xf32, #tpu.memory_space<vmem>>, vector<8x64xf32>,
    return
  }
  func.func @transform_0(%arg0: i32) -> (i32, i32) {
    %c0_i32 = arith.constant 0 : i32
    %c0_i32_0 = arith.constant 0 : i32
    return %arg0, %c0_i32 : i32, i32
  }
  func.func @transform_1(%arg0: i32) -> (i32, i32) {
    %c0_i32 = arith.constant 0 : i32
    %c0_i32_0 = arith.constant 0 : i32
    %c0_i32_1 = arith.constant 0 : i32
    return %c0_i32, %c0_i32_0 : i32, i32
  }
  func.func @transform_2(%arg0: i32) -> (i32, i32) {
    %c0_i32 = arith.constant 0 : i32
    %c0_i32_0 = arith.constant 0 : i32
    %c0_i32_1 = arith.constant 0 : i32
    return %c0_i32, %c0_i32_0 : i32, i32
  }
  func.func @transform_3(%arg0: i32) -> (i32, i32) {
    %c0_i32 = arith.constant 0 : i32
    %c0_i32_0 = arith.constant 0 : i32
    %c0_i32_1 = arith.constant 0 : i32
    return %c0_i32, %c0_i32_0 : i32, i32
  }
  func.func @transform_4(%arg0: i32) -> (i32, i32) {
    %c0_i32 = arith.constant 0 : i32
    %c0_i32_0 = arith.constant 0 : i32
    %c0_i32_1 = arith.constant 0 : i32
    return %c0_i32, %c0_i32_0 : i32, i32
  }
  func.func @transform_5(%arg0: i32) -> (i32, i32) {
    %c0_i32 = arith.constant 0 : i32
    %c0_i32_0 = arith.constant 0 : i32
    return %arg0, %c0_i32 : i32, i32
  }
}

</mosaic_0001>

<bundles_post_ra>
// kernel: tpu_custom_call.1
= control target key start
LH: loop header
LB: loop body
LE: loop exit
PB: predicated region body
PF: predicated region fallthrough
CT: control target
= control target key end

     0   :  { %10 = vsyncpa [#allocation3], 0  ;;  %v493_v2 = vmov 0   ;;  %v42_v35 = vlaneseq  ;;  %vm352_vm0 = vcmask 523264   ;;  %s644_s0 = inlined_call_operand.vmem [shape: f32[1,128], index: 0, kind: input, shape index: {}]   ;;  %s645_s1 = inlined_call_operand.vmem [shape: bf16[128,256], index: 1, kind: input, shape index: {}]   ;;  %s646_s2 = inlined_call_operand.vmem [shape: f32[1,256], index: 2, kind: input, shape index: {}]   ;;  %s647_s3 = inlined_call_operand.vmem [shape: bf16[256,64], index: 3, kind: input, shape index: {}]   ;;  %s648_s4 = inlined_call_operand.vmem [shape: f32[1,64], index: 4, kind: input, shape index: {}]   ;;  %s649_s5 = inlined_call_operand.hbm [shape: f32[1,64], index: 5, kind: output, shape index: {}]  }
   0x1   :  { %v429_v0 = vld [vmem:[%s645_s1 + $0x4] ss:$8 sps:$4 sm:$0xff]   ;;  %v431_v1 = vld [vmem:[%s645_s1] ss:$8 sps:$4 sm:$0xff]   ;;  %164 = vmatprep.mubr.bf16.mxu0 %v493_v2  ;;  %v432_v3 = vld [vmem:[%s645_s1 + $0x14] ss:$8 sps:$4 sm:$0xff]  }
   0x2   :  { %132 = vmatprep.subr.bf16.mxu0 %v429_v0  ;;  %v434_v4 = vld [vmem:[%s645_s1 + $0x10] ss:$8 sps:$4 sm:$0xff]   ;;  %v435_v5 = vld [vmem:[%s645_s1 + $0x24] ss:$8 sps:$4 sm:$0xff]   ;;  %v437_v6 = vld [vmem:[%s645_s1 + $0x20] ss:$8 sps:$4 sm:$0xff]  }
   0x3   :  { %133 = vmatpush1.bf16.msra.mxu0 %v431_v1  ;;  %v438_v7 = vld [vmem:[%s645_s1 + $0x34] ss:$8 sps:$4 sm:$0xff]   ;;  %v440_v8 = vld [vmem:[%s645_s1 + $0x30] ss:$8 sps:$4 sm:$0xff]   ;;  %v441_v9 = vld [vmem:[%s645_s1 + $0x44] ss:$8 sps:$4 sm:$0xff]  }
   0x4   :  { %134 = vmatprep.subr.bf16.mxu0 %v432_v3  ;;  %v453_v10 = vld [vmem:[%s647_s3 + $0x40] sm:$0xff]   ;;  %v455_v13 = vld [vmem:[%s647_s3 + $0x48] sm:$0xff]   ;;  %v457_v15 = vld [vmem:[%s647_s3 + $0x50] sm:$0xff]   ;;  %v43_v36 = vshrl.u32 %v42_v35, 7 }
   0x5   :  { %v454_v11 = vld [vmem:[%s647_s3] sm:$0xff]   ;;  %403 = vmatprep.subr.bf16.mxu1 %v453_v10  ;;  %v456_v14 = vld [vmem:[%s647_s3 + $0x8] sm:$0xff]   ;;  %v444_v16 = vld [vmem:[%s645_s1 + $0x54] ss:$8 sps:$4 sm:$0xff]  }
   0x6   :  { %v443_v12 = vld [vmem:[%s645_s1 + $0x40] ss:$8 sps:$4 sm:$0xff]   ;;  %404 = vmatpush3.bf16.msra.mxu1 %v454_v11  ;;  %v446_v17 = vld [vmem:[%s645_s1 + $0x50] ss:$8 sps:$4 sm:$0xff]   ;;  %v447_v20 = vld [vmem:[%s645_s1 + $0x64] ss:$8 sps:$4 sm:$0xff]  }
   0x7   :  { %135 = vmatpush1.bf16.msra.mxu0 %v434_v4  ;;  %405 = vmatprep.subr.bf16.mxu1 %v455_v13  ;;  %v458_v18 = vld [vmem:[%s647_s3 + $0x10] sm:$0xff]   ;;  %v459_v19 = vld [vmem:[%s647_s3 + $0x58] sm:$0xff]   ;;  %v449_v21 = vld [vmem:[%s645_s1 + $0x60] ss:$8 sps:$4 sm:$0xff]   ;;  %v44_v37 = vsub.s32 0, %v43_v36  ;;  %v48_v39 = vsub.s32 1, %v43_v36 }
   0x8   :  { %136 = vmatprep.subr.bf16.mxu0 %v435_v5  ;;  %v450_v22 = vld [vmem:[%s645_s1 + $0x74] ss:$8 sps:$4 sm:$0xff]   ;;  %v461_v24 = vld [vmem:[%s647_s3 + $0x60] sm:$0xff]   ;;  %v452_v26 = vld [vmem:[%s645_s1 + $0x70] ss:$8 sps:$4 sm:$0xff]  }
   0x9   :  { %v460_v23 = vld [vmem:[%s647_s3 + $0x18] sm:$0xff]   ;;  %v462_v25 = vld [vmem:[%s647_s3 + $0x20] sm:$0xff]   ;;  %v463_v28 = vld [vmem:[%s647_s3 + $0x68] sm:$0xff]  }
   0xa   :  { %406 = vmatpush3.bf16.msra.mxu1 %v456_v14  ;;  %v22_v27 = vld [vmem:[%s644_s0] sm:$0xff]  ;;  %v464_v30 = vld [vmem:[%s647_s3 + $0x28] sm:$0xff]   ;;  %v465_v31 = vld [vmem:[%s647_s3 + $0x70] sm:$0xff]  }
   0xb   :  { %137 = vmatpush1.bf16.msra.mxu0 %v437_v6  ;;  %407 = vmatprep.subr.bf16.mxu1 %v457_v15  ;;  %v23_v29 = vpack.c.bf16 %v22_v27, %v22_v27  ;;  %v466_v32 = vld [vmem:[%s647_s3 + $0x30] sm:$0xff]   ;;  %v467_v33 = vld [vmem:[%s647_s3 + $0x78] sm:$0xff]   ;;  %v40_v38 = vld [vmem:[%s646_s2] sm:$0x3] }
   0xc   :  { %138 = vmatprep.subr.bf16.mxu0 %v438_v7  ;;  %v468_v34 = vld [vmem:[%s647_s3 + $0x38] sm:$0xff]   ;;  %v45_v40 = vrot.slane %v40_v38, %v44_v37  ;;  %v49_v41 = vrot.slane %v40_v38, %v48_v39  ;;  %v386_v53 = vld [vmem:[%s648_s4] ss:$0 sm:$0xff] }
   0xe   :  { %408 = vmatpush3.bf16.msra.mxu1 %v458_v18 }
   0xf   :  { %139 = vmatpush1.bf16.msra.mxu0 %v440_v8  ;;  %409 = vmatprep.subr.bf16.mxu1 %v459_v19 }
  0x10   :  { %140 = vmatprep.subr.bf16.mxu0 %v441_v9 }
  0x12   :  { %410 = vmatpush3.bf16.msra.mxu1 %v460_v23 }
  0x13   :  { %141 = vmatpush1.bf16.msra.mxu0 %v443_v12  ;;  %411 = vmatprep.subr.bf16.mxu1 %v461_v24 }
  0x14   :  { %142 = vmatprep.subr.bf16.mxu0 %v444_v16 }
  0x16   :  { %412 = vmatpush3.bf16.msra.mxu1 %v462_v25 }
  0x17   :  { %143 = vmatpush1.bf16.msra.mxu0 %v446_v17  ;;  %413 = vmatprep.subr.bf16.mxu1 %v463_v28 }
  0x18   :  { %144 = vmatprep.subr.bf16.mxu0 %v447_v20 }
  0x1a   :  { %414 = vmatpush3.bf16.msra.mxu1 %v464_v30 }
  0x1b   :  { %145 = vmatpush1.bf16.msra.mxu0 %v449_v21  ;;  %415 = vmatprep.subr.bf16.mxu1 %v465_v31 }
  0x1c   :  { %146 = vmatprep.subr.bf16.mxu0 %v450_v22 }
  0x1e   :  { %416 = vmatpush3.bf16.msra.mxu1 %v466_v32 }
  0x1f   :  { %147 = vmatpush1.bf16.msra.mxu0 %v452_v26  ;;  %417 = vmatprep.subr.bf16.mxu1 %v467_v33 }
  0x22   :  { %165 = vmatmul.mubr.bf16.vlgmr.msra.gmra.mrb[0].mxu0 %v23_v29  ;;  %418 = vmatpush3.bf16.msra.mxu1 %v468_v34 }
  0xf5   :  { %v166_v42 = vpop.f32.mrb[0].mxu0 }
  0xf6   :  { %v167_v43 = vadd.f32 %v166_v42, %v45_v40  ;;  %v168_v44 = vpop.f32.mrb[1].mxu0 }
  0xf7   :  { %v169_v45 = vadd.f32 %v168_v44, %v49_v41  ;;  %v170_v46 = vpop.f32.mrb[2].mxu0 }
  0xf8   :  { %v173_v47 = vmax.f32 %v167_v43, 0.0  ;;  %v171_v48 = vpop.f32.mrb[3].mxu0 }
  0xf9   :  { %v174_v49 = vmax.f32 %v169_v45, 0.0 }
  0xfa   :  { %v175_v51 = vpack.c.bf16 %v173_v47, %v173_v47 }
  0xfb   :  { %v176_v50 = vpack.c.bf16 %v174_v49, %v174_v49 }
  0xfd   :  { %344 = vmatprep.mubr.bf16.mxu1 %v176_v50 }
  0xfe   :  { %345 = vmatmul.mubr.bf16.vlgmr.msra.gmra.mrb[0].mxu1 %v175_v51 }
 0x1d1   :  { %v419_v52 = vpop.f32.mrb[0].mxu1 }
 0x1d2   :  { %v420_v54 = vpop.f32.mrb[1].mxu1 }
 0x1d3   :  { %v421_v55 = vadd.f32 %v420_v54, %v419_v52  ;;  %v422_v56 = vpop.f32.mrb[2].mxu1 }
 0x1d4   :  { %v423_v57 = vpop.f32.mrb[3].mxu1 }
 0x1d5   :  { %v347_v58 = vadd.f32 %v421_v55, %v386_v53 }
 0x1d7   :  { %353 = vst.msk [vmem:[#allocation2] sm:$0xff] %vm352_vm0, %v347_v58 }
 0x1d8   :  { %358 = vsyncadd [#allocation3], 112  ;;  %s494_s2 = smov [#allocation2]  }
 0x1d9   :  { %s359_s10 = sshll.u32 %s494_s2, 4  ;;  %s360_s10 = int_to_ptr.vmem [resolvable:$true] %s359_s10 }
 0x1da   :  { %s469_s11 = scalar_lea.vmem %s360_s10, 16  ;;  %s473_s12 = scalar_lea.vmem %s360_s10, 128 }
 0x1db   :  { %p470_p0 = scmp.ne.s32.totalorder %s360_s10, %s469_s11  ;;  %p474_p1 = scmp.lt.s32.totalorder %s360_s10, %s360_s10 }
 0x1dc   :  { %p475_p2 = scmp.lt.s32.totalorder %s473_s12, %s469_s11 }
 0x1de   :  { %p476_p3 = por %p475_p2, %p474_p1 }
 0x1e0   :  { %p477_p4 = pnand %p476_p3, %p470_p0 }
 0x1e2   :  { %480 = shalt.err (!%p477_p4)
}
 0x1e3   :  { %s481_s14 = scalar_lea.hbm %s649_s5, 16 }
 0x1e4   :  { %p482_p5 = scmp.ne.s32.totalorder %s649_s5, %s481_s14  ;;  %p485_p6 = scmp.lt.u32.totalorder %s481_s14, %s649_s5 }
 0x1e6   :  { %p487_p7 = pnand %p485_p6, %p482_p5 }
 0x1e8   :  { %490 = shalt.err (!%p487_p7)
}
 0x1e9   :  { %s495_s19 = smov 16   ;;  %s496_s20 = smov 1  }
 0x1ea   :  { %365 = dma.vmem_to_hbm [thread:$0]  %s360_s10, 16, %s649_s5, [#allocation3], %s495_s19, %s495_s19, %s496_s20  }
 0x1eb   :  { %491 = dma.done.wait [#allocation3], 128  }
 0x1ec   :  { %492 = vsyncadd [#allocation3], 4294967168 }
 0x1ed   :  { %369 = vsyncpa [#allocation3], 1 }

</bundles_post_ra>
